<compile_context>
chip_gen: v7x
topology: tpu7x:2x2x1
jax: 0.10.0
libtpu: 0.0.40
codegen_flags: <defaults>
</compile_context>

<pallas_src>
import jax
import jax.numpy as jnp
from jax.experimental import pallas as pl
from jax.experimental.pallas import tpu as pltpu

LANE = 128          # feature padding target (lane width)
TILE_K = 512        # reduction tile on the flattened (relation, src-node) axis


def _round_up(v, m):
    return (v + m - 1) // m * m


def _vmem_limit(block_bytes, scratch_bytes=0):
    # 2x for double-buffering every block + headroom for compiler-internal
    # scratch; clamp to [8 MiB, 32 MiB] so we stay well inside v7x's 64 MiB/TC
    # while never under-provisioning.
    need = 2 * block_bytes + scratch_bytes + (4 << 20)
    return int(min(max(need, 8 << 20), 32 << 20))


# ---------------------------------------------------------------------------
# Per-relation message precompute:  msg_cat[r*Np + j, :] = x[j] @ W_rel[r]
# Grid: (r = relation, i = node row tile).  Run ONCE per layer.
# ---------------------------------------------------------------------------
def _msg_kernel(x_ref, w_ref, out_ref):
    out_ref[...] = jnp.dot(x_ref[...], w_ref[0],
                           preferred_element_type=jnp.float32
                           ).astype(out_ref.dtype)


def _rgcn_messages(x_bf16, w_rel_bf16):
    np_, fp = x_bf16.shape
    r, _, hp = w_rel_bf16.shape
    tile = 128
    ntk = np_ // tile
    block_bytes = (tile * fp + fp * hp + tile * hp) * 2

    return pl.pallas_call(
        _msg_kernel,
        out_shape=jax.ShapeDtypeStruct((r * np_, hp), jnp.bfloat16),
        grid_spec=pltpu.PrefetchScalarGridSpec(
            num_scalar_prefetch=0,
            grid=(r, ntk),
            in_specs=[
                pl.BlockSpec((tile, fp), lambda rr, i: (i, 0)),
                pl.BlockSpec((1, fp, hp), lambda rr, i: (rr, 0, 0)),
            ],
            out_specs=pl.BlockSpec((tile, hp), lambda rr, i: (rr * ntk + i, 0)),
        ),
        compiler_params=pltpu.CompilerParams(
            dimension_semantics=("parallel", "parallel"),
            vmem_limit_bytes=_vmem_limit(block_bytes),
        ),
        cost_estimate=pl.CostEstimate(
            flops=int(2 * r * np_ * fp * hp), transcendentals=0,
            bytes_accessed=int((r * np_ * fp + r * fp * hp + r * np_ * hp) * 2)),
    )(x_bf16, w_rel_bf16)


# ---------------------------------------------------------------------------
# One RGCNConv layer (aggregation only; messages are precomputed):
#   out = relu(x @ W_root + b + adj_cat @ msg_cat)
# Grid: (i = dst row tile [parallel], kk = flattened reduction tile [arbitrary])
# f32 VMEM accumulator (kept instead of accumulating into the bf16 out_ref so
# the long reduction stays in f32), bf16 lane-dense output.
# ---------------------------------------------------------------------------
def _rgcn_agg_kernel(adj_ref, msg_ref, x_ref, w_root_ref, b_ref,
                     out_ref, acc_ref):
    kk = pl.program_id(1)

    @pl.when(kk == 0)
    def _init():
        acc_ref[...] = jnp.zeros_like(acc_ref)

    acc_ref[...] += jnp.dot(adj_ref[...], msg_ref[...],
                            preferred_element_type=jnp.float32)

    @pl.when(kk == pl.num_programs(1) - 1)
    def _finalize():
        h = (jnp.dot(x_ref[...], w_root_ref[...],
                     preferred_element_type=jnp.float32)
             + b_ref[...] + acc_ref[...])
        out_ref[...] = jnp.maximum(h, 0.0).astype(out_ref.dtype)


def _rgcn_conv(x_bf16, adj_cat, msg_cat, w_root_bf16, b_f32):
    np_, fp = x_bf16.shape
    kp = adj_cat.shape[1]
    hp = w_root_bf16.shape[1]
    # Keep >= 2 destination-row tiles so the "parallel" axis shards across
    # v7x's two TensorCores even for single-tile graphs.
    tile_i = 64 if (np_ // 128) < 2 else 128
    ni = np_ // tile_i
    nkk = kp // TILE_K

    block_bytes = ((tile_i * TILE_K) + (TILE_K * hp) + (tile_i * fp)
                   + (fp * hp) + (tile_i * hp)) * 2 + 8 * hp * 4
    scratch_bytes = tile_i * hp * 4

    flops = int(2 * np_ * kp * hp + 2 * np_ * fp * hp)
    bytes_accessed = int(adj_cat.size * 2 + msg_cat.size * 2
                         + x_bf16.size * 2 + w_root_bf16.size * 2
                         + b_f32.size * 4 + np_ * hp * 2)

    # NOTE: pipeline_mode=pl.Buffered(3) on the adjacency BlockSpec is a cheap
    # further experiment once the loop is confirmed HBM-bound; left at the
    # default double-buffering here.
    return pl.pallas_call(
        _rgcn_agg_kernel,
        out_shape=jax.ShapeDtypeStruct((np_, hp), jnp.bfloat16),
        grid_spec=pltpu.PrefetchScalarGridSpec(
            num_scalar_prefetch=0,
            grid=(ni, nkk),
            in_specs=[
                # flattened per-relation adjacency block [TI, TK] (bf16)
                pl.BlockSpec((tile_i, TILE_K), lambda i, kk: (i, kk)),
                # precomputed messages for this reduction tile [TK, Hp] (bf16)
                pl.BlockSpec((TILE_K, hp), lambda i, kk: (kk, 0)),
                # x for the root term (dst rows; VMEM-resident across kk)
                pl.BlockSpec((tile_i, fp), lambda i, kk: (i, 0)),
                # root weight (resident)
                pl.BlockSpec((fp, hp), lambda i, kk: (0, 0)),
                # bias (resident)
                pl.BlockSpec((1, hp), lambda i, kk: (0, 0)),
            ],
            out_specs=pl.BlockSpec((tile_i, hp), lambda i, kk: (i, 0)),
            scratch_shapes=[pltpu.VMEM((tile_i, hp), jnp.float32)],
        ),
        compiler_params=pltpu.CompilerParams(
            dimension_semantics=("parallel", "arbitrary"),
            vmem_limit_bytes=_vmem_limit(block_bytes, scratch_bytes),
        ),
        cost_estimate=pl.CostEstimate(flops=flops, transcendentals=0,
                                      bytes_accessed=bytes_accessed),
    )(adj_cat, msg_cat, x_bf16, w_root_bf16, b_f32)


# ---------------------------------------------------------------------------
# global_mean_pool + fc:  out = (P @ h2) @ Wfc + bfc
# Grid: (k = node column tile [reduction]).
# ---------------------------------------------------------------------------
def _pool_fc_kernel(pool_ref, h_ref, wfc_ref, bfc_ref, out_ref, acc_ref):
    k = pl.program_id(0)

    @pl.when(k == 0)
    def _init():
        acc_ref[...] = jnp.zeros_like(acc_ref)

    acc_ref[...] += jnp.dot(pool_ref[...], h_ref[...],
                            preferred_element_type=jnp.float32)

    @pl.when(k == pl.num_programs(0) - 1)
    def _finalize():
        out_ref[...] = (jnp.dot(acc_ref[...].astype(jnp.bfloat16), wfc_ref[...],
                                preferred_element_type=jnp.float32)
                        + bfc_ref[...])


def _pool_fc(pool_bf16, h_bf16, wfc_bf16, bfc_f32):
    bp, np_ = pool_bf16.shape
    hp, cp = wfc_bf16.shape
    tile_p = 512 if np_ % 512 == 0 else (256 if np_ % 256 == 0 else 128)
    nk = np_ // tile_p

    block_bytes = (bp * tile_p + tile_p * hp + hp * cp + bp * cp) * 2 + 8 * cp * 4

    return pl.pallas_call(
        _pool_fc_kernel,
        out_shape=jax.ShapeDtypeStruct((bp, cp), jnp.float32),
        grid_spec=pltpu.PrefetchScalarGridSpec(
            num_scalar_prefetch=0,
            grid=(nk,),
            in_specs=[
                pl.BlockSpec((bp, tile_p), lambda k: (0, k)),   # pooling matrix
                pl.BlockSpec((tile_p, hp), lambda k: (k, 0)),   # h2 tile
                pl.BlockSpec((hp, cp), lambda k: (0, 0)),       # fc weight
                pl.BlockSpec((1, cp), lambda k: (0, 0)),        # fc bias
            ],
            out_specs=pl.BlockSpec((bp, cp), lambda k: (0, 0)),
            scratch_shapes=[pltpu.VMEM((bp, hp), jnp.float32)],
        ),
        compiler_params=pltpu.CompilerParams(
            dimension_semantics=("arbitrary",),
            vmem_limit_bytes=_vmem_limit(block_bytes, bp * hp * 4),
        ),
    )(pool_bf16, h_bf16, wfc_bf16, bfc_f32)


# ---------------------------------------------------------------------------
# Host glue: densify graph, pad to lane-friendly shapes, run the kernels.
# ---------------------------------------------------------------------------
def rgcn_graph_forward(x, edge_index, edge_type, batch, params,
                       num_relations, num_graphs):
    n, f = x.shape
    h1 = params["w1_root"].shape[1]
    h2 = params["w2_root"].shape[1]
    c = params["wfc"].shape[1]

    np_ = _round_up(n, 128)
    fp = _round_up(f, LANE)
    h1p = _round_up(h1, LANE)
    h2p = _round_up(h2, LANE)
    cp = _round_up(c, LANE)
    bp = _round_up(num_graphs, 8)
    kp = _round_up(num_relations * np_, TILE_K)

    # --- node features (bf16 MXU operand; padded rows/cols are zero) ---------
    x_pad = (jnp.zeros((np_, fp), jnp.bfloat16)
             .at[:n, :f].set(x.astype(jnp.bfloat16)))

    # --- flattened, row-normalized per-relation adjacency, built directly in
    #     the [Np, Kp] bf16 layout (mean aggregation; 1/deg folded per edge) ---
    src, dst = edge_index[0], edge_index[1]
    deg = jnp.zeros((np_, num_relations), jnp.float32).at[dst, edge_type].add(1.0)
    inv_deg = 1.0 / jnp.maximum(deg, 1.0)
    w_edge = inv_deg[dst, edge_type]                       # per-edge 1/deg (f32)
    col = edge_type * np_ + src                            # flattened column
    adj_cat = (jnp.zeros((np_, kp), jnp.float32)
               .at[dst, col].add(w_edge)).astype(jnp.bfloat16)

    # --- global_mean_pool as a [Bp, Np] averaging matrix ----------------------
    one_hot = (batch[None, :] == jnp.arange(num_graphs)[:, None]).astype(jnp.float32)
    pool = one_hot / jnp.maximum(one_hot.sum(axis=1, keepdims=True), 1.0)
    pool_pad = (jnp.zeros((bp, np_), jnp.float32)
                .at[:num_graphs, :n].set(pool)).astype(jnp.bfloat16)

    # --- zero-pad weights / biases to 128-lane slabs (weights bf16) -----------
    def pad2(w, s0, s1, dt):
        return jnp.zeros((s0, s1), dt).at[:w.shape[0], :w.shape[1]].set(w.astype(dt))

    w1_root = pad2(params["w1_root"], fp, h1p, jnp.bfloat16)
    w2_root = pad2(params["w2_root"], h1p, h2p, jnp.bfloat16)
    wfc = pad2(params["wfc"], h2p, cp, jnp.bfloat16)
    b1 = pad2(params["b1"], 1, h1p, jnp.float32)
    b2 = pad2(params["b2"], 1, h2p, jnp.float32)
    bfc = pad2(params["bfc"], 1, cp, jnp.float32)
    w1_rel = (jnp.zeros((num_relations, fp, h1p), jnp.bfloat16)
              .at[:, :f, :h1].set(params["w1_rel"].astype(jnp.bfloat16)))
    w2_rel = (jnp.zeros((num_relations, h1p, h2p), jnp.bfloat16)
              .at[:, :h1, :h2].set(params["w2_rel"].astype(jnp.bfloat16)))

    def pad_msg(m):   # zero-pad precomputed messages up to the padded K axis
        return jnp.pad(m, ((0, kp - m.shape[0]), (0, 0)))

    # --- layer 1: precompute messages once, then aggregate --------------------
    msg1 = pad_msg(_rgcn_messages(x_pad, w1_rel))          # [Kp, H1p] bf16
    h = _rgcn_conv(x_pad, adj_cat, msg1, w1_root, b1)      # [Np, H1p] bf16
    # --- layer 2 ---------------------------------------------------------------
    msg2 = pad_msg(_rgcn_messages(h, w2_rel))              # [Kp, H2p] bf16
    h = _rgcn_conv(h, adj_cat, msg2, w2_root, b2)          # [Np, H2p] bf16
    # --- pool + fc -------------------------------------------------------------
    out = _pool_fc(pool_pad, h, wfc, bfc)                  # [Bp, Cp] f32
    return out[:num_graphs, :c]


# ---------------------------------------------------------------------------
# Pure-JAX reference (f32) of the same forward pass, for a sanity check.
# ---------------------------------------------------------------------------
def rgcn_graph_reference(x, edge_index, edge_type, batch, params,
                         num_relations, num_graphs):
    n = x.shape[0]
    src, dst = edge_index[0], edge_index[1]
    adj = jnp.zeros((num_relations, n, n), jnp.float32)
    adj = adj.at[edge_type, dst, src].add(1.0)
    deg = adj.sum(axis=2, keepdims=True)
    adj = adj / jnp.maximum(deg, 1.0)

    def conv(h, w_root, w_rel, b):
        out = h @ w_root + b
        for r in range(num_relations):
            out = out + adj[r] @ (h @ w_rel[r])
        return jnp.maximum(out, 0.0)

    h = conv(x, params["w1_root"], params["w1_rel"], params["b1"])
    h = conv(h, params["w2_root"], params["w2_rel"], params["b2"])
    one_hot = (batch[None, :] == jnp.arange(num_graphs)[:, None]).astype(jnp.float32)
    pool = one_hot / jnp.maximum(one_hot.sum(axis=1, keepdims=True), 1.0)
    return (pool @ h) @ params["wfc"] + params["bfc"]


def init_params(key, num_node_features, num_classes, num_relations):
    h1, h2 = 16, 32
    ks = jax.random.split(key, 6)

    def glorot(k, shape):
        fan_in, fan_out = shape[-2], shape[-1]
        lim = (6.0 / (fan_in + fan_out)) ** 0.5
        return jax.random.uniform(k, shape, jnp.float32, -lim, lim)

    return {
        "w1_root": glorot(ks[0], (num_node_features, h1)),
        "w1_rel":  glorot(ks[1], (num_relations, num_node_features, h1)),
        "b1":      jnp.zeros((1, h1), jnp.float32),
        "w2_root": glorot(ks[2], (h1, h2)),
        "w2_rel":  glorot(ks[3], (num_relations, h1, h2)),
        "b2":      jnp.zeros((1, h2), jnp.float32),
        "wfc":     glorot(ks[4], (h2, num_classes)),
        "bfc":     jax.random.uniform(ks[5], (1, num_classes), jnp.float32,
                                      -0.1, 0.1),
    }


if __name__ == "__main__":
    num_node_features = 8
    num_classes = 3
    num_relations = 3        # num_unique_edge_attrs
    num_nodes = 16
    num_edges = 40
    num_graphs = 2

    key = jax.random.PRNGKey(0)
    k_x, k_src, k_dst, k_et, k_p = jax.random.split(key, 5)

    x = jax.random.normal(k_x, (num_nodes, num_node_features), jnp.float32)
    src = jax.random.randint(k_src, (num_edges,), 0, num_nodes)
    dst = jax.random.randint(k_dst, (num_edges,), 0, num_nodes)
    edge_index = jnp.stack([src, dst], axis=0)                  # [2, E]
    edge_type = jax.random.randint(k_et, (num_edges,), 0, num_relations)
    # first half of the nodes -> graph 0, second half -> graph 1
    batch = (jnp.arange(num_nodes) >= num_nodes // 2).astype(jnp.int32)

    params = init_params(k_p, num_node_features, num_classes, num_relations)

    out = rgcn_graph_forward(x, edge_index, edge_type, batch, params,
                             num_relations, num_graphs)
    jax.block_until_ready(out)
    assert out.shape == (num_graphs, num_classes)

    ref = rgcn_graph_reference(x, edge_index, edge_type, batch, params,
                               num_relations, num_graphs)
    # bf16 operands throughout (f32 accumulation) -> slightly looser tolerance
    # than a pure-f32 pipeline.
    max_err = float(jnp.max(jnp.abs(out - ref)))
    assert max_err < 2e-1, f"kernel/reference mismatch: max abs err {max_err}"
    print("KERNEL_OK")
</pallas_src>

<mosaic_0001>
module attributes {stable_mosaic.version = 11 : i64} {
  func.func @_msg_kernel(%arg0: i32, %arg1: i32, %arg2: memref<128x128xbf16, #tpu.memory_space<vmem>>, %arg3: memref<1x128x128xbf16, #tpu.memory_space<vmem>>, %arg4: memref<128x128xbf16, #tpu.memory_space<vmem>>) attributes {dimension_semantics = [#tpu.dimension_semantics<parallel>, #tpu.dimension_semantics<parallel>], iteration_bounds = array<i64: 3, 1>, scalar_prefetch = 0 : i64, scratch_operands = 0 : i64, tpu.core_type = #tpu.core_type<tc>, window_params = [{transform_indices = @transform_0, window_bounds = array<i64: 128, 128>}, {transform_indices = @transform_1, window_bounds = array<i64: 1, 128, 128>}, {transform_indices = @transform_2, window_bounds = array<i64: 128, 128>}]} {
    %c0 = arith.constant 0 : index
    %c0_0 = arith.constant 0 : index
    %0 = vector.load %arg2[%c0, %c0_0] : memref<128x128xbf16, #tpu.memory_space<vmem>>, vector<128x128xbf16>
    %c0_1 = arith.constant 0 : index
    %c0_2 = arith.constant 0 : index
    %c0_3 = arith.constant 0 : index
    %1 = vector.load %arg3[%c0_1, %c0_2, %c0_3] : memref<1x128x128xbf16, #tpu.memory_space<vmem>>, vector<1x128x128xbf16>
    %2 = vector.shape_cast %1 : vector<1x128x128xbf16> to vector<128x128xbf16>
    %cst = arith.constant dense<0.000000e+00> : vector<128x128xf32>
    %3 = tpu.matmul %0, %2, %cst {dimension_numbers = #tpu.dot_dimension_numbers<[1], [0], [0], [1], [0, 0, 1, 1], [], []>} : vector<128x128xbf16>, vector<128x128xbf16>, vector<128x128xf32> -> vector<128x128xf32>
    %4 = arith.truncf %3 : vector<128x128xf32> to vector<128x128xbf16>
    %c0_4 = arith.constant 0 : index
    %c0_5 = arith.constant 0 : index
    %5 = vector.load %arg4[%c0_4, %c0_5] : memref<128x128xbf16, #tpu.memory_space<vmem>>, vector<128x128xbf16>
    tpu.vector_store %arg4[%c0_4, %c0_5], %4 {strides = array<i32>} : memref<128x128xbf16, #tpu.memory_space<vmem>>, vector<128x128xbf16>,
    return
  }
  func.func @transform_0(%arg0: i32, %arg1: i32) -> (i32, i32) {
    %c0_i32 = arith.constant 0 : i32
    %c0_i32_0 = arith.constant 0 : i32
    return %arg1, %c0_i32 : i32, i32
  }
  func.func @transform_1(%arg0: i32, %arg1: i32) -> (i32, i32, i32) {
    %c0_i32 = arith.constant 0 : i32
    %c0_i32_0 = arith.constant 0 : i32
    %c0_i32_1 = arith.constant 0 : i32
    return %arg0, %c0_i32, %c0_i32_0 : i32, i32, i32
  }
  func.func @transform_2(%arg0: i32, %arg1: i32) -> (i32, i32) {
    %c1_i32 = arith.constant 1 : i32
    %0 = arith.muli %arg0, %c1_i32 : i32
    %1 = arith.addi %0, %arg1 : i32
    %c0_i32 = arith.constant 0 : i32
    %c0_i32_0 = arith.constant 0 : i32
    return %1, %c0_i32 : i32, i32
  }
}

</mosaic_0001>

<bundles_post_ra>
// kernel: tpu_custom_call.1
= control target key start
LH: loop header
LB: loop body
LE: loop exit
PB: predicated region body
PF: predicated region fallthrough
CT: control target
= control target key end

     0   :  { %7 = vsyncpa [#allocation3], 0  ;;  %s1295_s0 = inlined_call_operand.hbm [shape: bf16[128,128], index: 0, kind: input, shape index: {}]   ;;  %s1296_s1 = inlined_call_operand.hbm [shape: bf16[3,128,128], index: 1, kind: input, shape index: {}]   ;;  %s1297_s2 = inlined_call_operand.hbm [shape: bf16[384,128], index: 2, kind: output, shape index: {}]  }
   0x1   :  { %8 = vsyncpa [#allocation6], 0 }
   0x2   :  { %10 = vsyncpa [#allocation6 + $0x1], 0 }
   0x3   :  { %11 = vsyncpa [#allocation4], 0 }
   0x4   :  { %13 = vsyncpa [#allocation4 + $0x1], 0  ;;  %s1058_s9 = smov 0   ;;  %s1060_s10 = smov 0  }
   0x5   :  { %s1062_s11 = smov 0   ;;  %s1064_s12 = smov 0  }
   0x6   :  { %s1066_s13 = smov 0   ;;  %s1068_s14 = smov 0  }
   0x7 LB: > { %s619_s15 = sadd.s32 4294967295, %s1034_s14   ;;  %s620_s16 = sadd.s32 4294967294, %s1034_s14   ;;  %s1034_s14 = sphi %s1068_s14, %s19_s14   ;;  %s1030_s13 = sphi %s1066_s13, %s1320_s13   ;;  %s1026_s12 = sphi %s1064_s12, %s1319_s12   ;;  %s1022_s11 = sphi %s1062_s11, %s1318_s11   ;;  %s1018_s10 = sphi %s1060_s10, %s1317_s10   ;;  %s1014_s9 = sphi %s1058_s9, %s1316_s9  }
   0x8   : > { %p77_p0 = scmp.ne.s32.totalorder %s1018_s10, %s1014_s9  ;;  %p1092_p1 = scmp.eq.s32.totalorder %s619_s15, 0 }
   0x9   : > { %p1096_p2 = scmp.eq.s32.totalorder %s619_s15, 2  ;;  %p109_p3 = scmp.eq.s32.totalorder %s620_s16, 2 }
   0xa   : > { %s1302_s17 = scalar_select %p1092_p1, 1, 0 }
   0xb   : > { %s1303_s18 = scalar_select %p1096_p2, 1, 0 }
   0xc   : > { %p1102_p4 = por %p1092_p1, %p77_p0  ;;  %p621_p5 = scmp.ge.s32.totalorder %s1034_s14, 1 }
   0xd   : > { %p1107_p6 = por %p109_p3, %p77_p0  ;;  %p116_p7 = scmp.lt.s32.totalorder %s1034_s14, 4 }
   0xe   : > { %s1304_s19 = scalar_select %p1102_p4, 1, 0 }
   0xf   : > { %s1305_s20 = scalar_select %p1107_p6, 1, 0 }
  0x10   : > { %p1112_p8 = pnand %p621_p5, %p116_p7  ;;  %s1036_s22 = smov [#allocation2]  }
  0x11   : > { %s131_s23 = sshll.u32 %s1036_s22, 4  ;;  %s31_s25 = sadd.s32 1, %s1030_s13  ;;  %s132_s23 = int_to_ptr.vmem [resolvable:$true] %s131_s23 }
  0x12   : > { %s1306_s21 = scalar_select %p1112_p8, 1, 0 }
  0x13   : > { %p805_p9 = pneg %p1112_p8  ;;  %s890_s28 = scalar_lea.hbm %s1295_s0, 1024 }
  0x14   : > { %p891_p11 = scmp.ne.s32.totalorder %s1295_s0, %s890_s28  ;;  %p897_p3 = scmp.lt.u32.totalorder %s890_s28, %s1295_s0 }
  0x15   : > { %p1120_p10 = pnand %p805_p9, %p1092_p1 }
  0x17   : > { %p892_p12 = pneg %p1120_p10 }
  0x19   : > { %p893_p13 = pnand %p892_p12, %p891_p11 }
  0x1b   : > { %p894_p0 = pneg %p893_p13 }
  0x1d   : > { %p899_p5 = pnand %p897_p3, %p894_p0 }
  0x1f   : > { %902 = shalt.err (!%p899_p5)
}
  0x20   : > { %s903_s5 = scalar_lea.vmem %s132_s23, 1024  ;;  %p911_p4 = scmp.lt.s32.totalorder %s132_s23, %s132_s23 }
  0x21   : > { %p904_p7 = scmp.ne.s32.totalorder %s132_s23, %s903_s5  ;;  %p912_p1 = scmp.lt.s32.totalorder %s903_s5, %s903_s5 }
  0x23   : > { %p906_p9 = pnand %p904_p7, %p892_p12  ;;  %p913_p8 = por %p912_p1, %p911_p4 }
  0x25   : > { %p907_p6 = pneg %p906_p9 }
  0x27   : > { %p914_p2 = pnand %p913_p8, %p907_p6 }
  0x29   : > { %917 = shalt.err (!%p914_p2)
}
  0x2a   : > { %s1037_s6 = smov 64   ;;  %s1038_s7 = smov 4  }
  0x2b   : > { %808 = dma.hbm_to_vmem [thread:$0]  (!%p1120_p10), %s1295_s0, 1024, %s132_s23, [#allocation3], %s1037_s6, %s1037_s6, %s1038_s7  }
  0x2c   : > { %p33_p1 = scmp.ge.s32.totalorder %s31_s25, 3  ;;  %s64_s16 = sadd.s32 1, %s1022_s11 }
  0x2d   : > { %p71_p2 = scmp.ne.s32.totalorder %s1022_s11, %s1018_s10  ;;  %p72_p4 = scmp.eq.s32.totalorder %s1034_s14, 0 }
  0x2e   : > { %s1322_s25 = smov (%p33_p1, %s31_s25), 0  ;;  %p1309_p8 = scmp.ne.s32.totalorder %s1303_s18, 0 }
  0x2f   : > { %p1150_p6 = por %p72_p4, %p71_p2  ;;  %s61_s26 = ssub.s32 %s1030_s13, %s1322_s25 }
  0x30   : > { %p1156_p11 = por %p1309_p8, %p71_p2  ;;  %p818_p12 = scmp.lt.s32.totalorder %s1034_s14, 3 }
  0x31   : > { %p62_p10 = scmp.eq.s32.totalorder %s61_s26, 0  ;;  %s145_s23 = sand.u32 1, %s1022_s11  }
  0x32   : > { %s624_s27 = sshll.u32 %s145_s23, 6  ;;  %s668_s29 = sshll.u32 %s1030_s13, 10 }
  0x33   : > { %s1165_s28 = scalar_select %p62_p10, %s1022_s11, %s64_s16  }
  0x34   : > { %s1171_s4 = scalar_lea.hbm %s1296_s1, %s668_s29  ;;  %s149_s18 = scalar_lea.vmem [#allocation5], %s624_s27 }
  0x35   : > { %s156_s5 = sshll.u32 %s149_s18, 4  ;;  %p1177_p13 = pnand %p818_p12, %p1150_p6  ;;  %s1173_s5 = int_to_ptr.vmem [resolvable:$true] %s156_s5 }
  0x36   : > { %s1181_s15 = scalar_lea.sflag [#allocation6], %s145_s23  ;;  %s918_s16 = scalar_lea.hbm %s1171_s4, 1024 }
  0x37   : > { %p919_p0 = scmp.ne.s32.totalorder %s1171_s4, %s918_s16  ;;  %p920_p3 = pneg %p1177_p13 }
  0x38   : > { %s923_s22 = scalar_lea.hbm %s1296_s1, 3072  ;;  %p924_p9 = scmp.lt.u32.totalorder %s1171_s4, %s1296_s1 }
  0x39   : > { %p921_p5 = pnand %p920_p3, %p919_p0  ;;  %p925_p1 = scmp.lt.u32.totalorder %s923_s22, %s918_s16 }
  0x3a   : > { %p927_p4 = scmp.lt.u32.totalorder %s918_s16, %s1171_s4 }
  0x3b   : > { %p922_p7 = pneg %p921_p5  ;;  %p926_p2 = por %p925_p1, %p924_p9 }
  0x3d   : > { %p928_p6 = por %p927_p4, %p926_p2 }
  0x3f   : > { %p929_p8 = pnand %p928_p6, %p922_p7 }
  0x41   : > { %932 = shalt.err (!%p929_p8)
}
  0x42   : > { %s933_s23 = scalar_lea.vmem %s1173_s5, 1024  ;;  %s1039_s3 = smov [#allocation5]  }
  0x43   : > { %p934_p12 = scmp.ne.s32.totalorder %s1173_s5, %s933_s23  ;;  %s938_s18 = sshll.u32 %s1039_s3, 4  ;;  %s939_s18 = int_to_ptr.vmem [resolvable:$false] %s938_s18 }
  0x44   : > { %s940_s26 = scalar_lea.vmem %s939_s18, 2048  ;;  %p941_p5 = scmp.lt.s32.totalorder %s1173_s5, %s939_s18 }
  0x45   : > { %p936_p10 = pnand %p934_p12, %p920_p3  ;;  %p942_p9 = scmp.lt.s32.totalorder %s940_s26, %s933_s23 }
  0x47   : > { %p937_p0 = pneg %p936_p10  ;;  %p943_p1 = por %p942_p9, %p941_p5 }
  0x49   : > { %p944_p2 = pnand %p943_p1, %p937_p0 }
  0x4b   : > { %947 = shalt.err (!%p944_p2)
}
  0x4c   : > { %812 = dma.hbm_to_vmem [thread:$0]  (!%p1177_p13), %s1171_s4, 1024, %s1173_s5, %s1181_s15, %s1037_s6, %s1037_s6, %s1038_s7  }
  0x4d   : > { %p1312_p3 = scmp.ne.s32.totalorder %s1306_s21, 0 }
  0x4e   : > { %p1313_p7 = scmp.ne.s32.totalorder (!%p1312_p3), %s1302_s17, 0 }
  0x4f   : > { %168 = sbr.rel (%p1312_p3) target bundleno = 364 (0x16c), region = 28 }
  0x56   : > { %1001 = dma.done.wait (%p1313_p7), [#allocation3], 1024  }
  0x57   : > { %1003 = vsyncadd (%p1313_p7), [#allocation3], 4294966272  ;;  %s1219_s16 = sand.u32 1, %s1018_s10   ;;  %p1314_p13 = scmp.ne.s32.totalorder %s1304_s19, 0 }
  0x58   : > { %s629_s8 = sshll.u32 %s1219_s16, 6  ;;  %s175_s27 = scalar_lea.sflag [#allocation6], %s1219_s16 }
  0x59   : > { %s1225_s6 = scalar_lea.vmem [#allocation5], %s629_s8 }
  0x5a   : > { %1005 = dma.done.wait (%p1314_p13), %s175_s27, 1024  }
  0x5b   : > { %1007 = vsyncadd (%p1314_p13), %s175_s27, 4294966272  ;;  %v874_v0 = vld [vmem:[%s1225_s6] sm:$0xff]   ;;  %v875_v1 = vld [vmem:[%s1225_s6 + $0x8] sm:$0xff]   ;;  %s198_s17 = scalar_lea.vmem [#allocation7], %s629_s8  ;;  %s685_s21 = sshll.u32 %s1026_s12, 10 }
  0x5c   : > { %749 = vmatprep.subr.bf16.mxu0 %v874_v0  ;;  %781 = vmatprep.subr.bf16.mxu1 %v874_v0  ;;  %v876_v2 = vld [vmem:[%s1225_s6 + $0x10] sm:$0xff]   ;;  %v877_v3 = vld [vmem:[%s1225_s6 + $0x18] sm:$0xff]   ;;  %v882_v4 = vld [vmem:[#allocation2] sm:$0xff]   ;;  %s523_s19 = sshll.u32 %s198_s17, 4  ;;  %s1247_s5 = scalar_lea.hbm %s1297_s2, %s685_s21  ;;  %s1242_s19 = int_to_ptr.vmem [resolvable:$true] %s523_s19 }
  0x5d   : > { %750 = vmatpush3.bf16.msra.mxu0 %v874_v0  ;;  %789 = vmatpush3.bf16.msra.mxu1 %v874_v0  ;;  %v883_v5 = vld [vmem:[#allocation2 + $0x20] sm:$0xff]   ;;  %v879_v7 = vld [vmem:[%s1225_s6 + $0x28] sm:$0xff]   ;;  %v880_v8 = vld [vmem:[%s1225_s6 + $0x30] sm:$0xff]   ;;  %s509_s12 = scalar_lea.sflag [#allocation4], %s1219_s16  ;;  %s948_s15 = scalar_lea.vmem %s1242_s19, 1024 }
  0x5e   : > { %751 = vmatprep.subr.bf16.mxu0 %v875_v1  ;;  %782 = vmatprep.subr.bf16.mxu1 %v875_v1  ;;  %v878_v6 = vld [vmem:[%s1225_s6 + $0x20] sm:$0xff]   ;;  %v881_v9 = vld [vmem:[%s1225_s6 + $0x38] sm:$0xff]   ;;  %v884_v10 = vld [vmem:[#allocation2 + $0x8] sm:$0xff]   ;;  %p949_p4 = scmp.ne.s32.totalorder %s1242_s19, %s948_s15  ;;  %s1040_s22 = smov [#allocation7]  }
  0x5f   : > { %765 = vmatprep.mubr.bf16.mxu0 %v882_v4  ;;  %773 = vmatprep.mubr.bf16.mxu1 %v883_v5  ;;  %v885_v11 = vld [vmem:[#allocation2 + $0x28] sm:$0xff]   ;;  %v886_v12 = vld [vmem:[#allocation2 + $0x10] sm:$0xff]   ;;  %v888_v14 = vld [vmem:[#allocation2 + $0x18] sm:$0xff]   ;;  %s952_s29 = sshll.u32 %s1040_s22, 4  ;;  %s953_s29 = int_to_ptr.vmem [resolvable:$false] %s952_s29 }
  0x60   : > { %v887_v13 = vld [vmem:[#allocation2 + $0x30] sm:$0xff]   ;;  %v889_v15 = vld [vmem:[#allocation2 + $0x38] sm:$0xff]   ;;  %p950_p6 = pnand %p949_p4, %p1156_p11  ;;  %s954_s30 = scalar_lea.vmem %s953_s29, 2048 }
  0x61   : > { %752 = vmatpush3.bf16.msra.mxu0 %v875_v1  ;;  %790 = vmatpush3.bf16.msra.mxu1 %v875_v1  ;;  %p955_p12 = scmp.lt.s32.totalorder %s1242_s19, %s953_s29  ;;  %p956_p10 = scmp.lt.s32.totalorder %s954_s30, %s948_s15 }
  0x62   : > { %753 = vmatprep.subr.bf16.mxu0 %v876_v2  ;;  %783 = vmatprep.subr.bf16.mxu1 %v876_v2  ;;  %p951_p8 = pneg %p950_p6 }
  0x63   : > { %p957_p0 = por %p956_p10, %p955_p12 }
  0x65   : > { %754 = vmatpush3.bf16.msra.mxu0 %v876_v2  ;;  %791 = vmatpush3.bf16.msra.mxu1 %v876_v2  ;;  %p958_p5 = pnand %p957_p0, %p951_p8 }
  0x66   : > { %755 = vmatprep.subr.bf16.mxu0 %v877_v3  ;;  %784 = vmatprep.subr.bf16.mxu1 %v877_v3 }
  0x69   : > { %756 = vmatpush3.bf16.msra.mxu0 %v877_v3  ;;  %792 = vmatpush3.bf16.msra.mxu1 %v877_v3 }
  0x6a   : > { %757 = vmatprep.subr.bf16.mxu0 %v878_v6  ;;  %785 = vmatprep.subr.bf16.mxu1 %v878_v6 }
  0x6d   : > { %758 = vmatpush3.bf16.msra.mxu0 %v878_v6  ;;  %793 = vmatpush3.bf16.msra.mxu1 %v878_v6 }
  0x6e   : > { %759 = vmatprep.subr.bf16.mxu0 %v879_v7  ;;  %786 = vmatprep.subr.bf16.mxu1 %v879_v7 }
  0x71   : > { %760 = vmatpush3.bf16.msra.mxu0 %v879_v7  ;;  %794 = vmatpush3.bf16.msra.mxu1 %v879_v7 }
  0x72   : > { %761 = vmatprep.subr.bf16.mxu0 %v880_v8  ;;  %787 = vmatprep.subr.bf16.mxu1 %v880_v8 }
  0x75   : > { %762 = vmatpush3.bf16.msra.mxu0 %v880_v8  ;;  %795 = vmatpush3.bf16.msra.mxu1 %v880_v8 }
  0x76   : > { %763 = vmatprep.subr.bf16.mxu0 %v881_v9  ;;  %788 = vmatprep.subr.bf16.mxu1 %v881_v9 }
  0x79   : > { %764 = vmatpush3.bf16.msra.mxu0 %v881_v9  ;;  %796 = vmatpush3.bf16.msra.mxu1 %v881_v9 }
  0x7c   : > { %766 = vmatmul.mubr.bf16.vlgmr.msra.gmra.mrb[0].mxu0 %v884_v10  ;;  %774 = vmatmul.mubr.bf16.vlgmr.msra.gmra.mrb[0].mxu1 %v885_v11 }
  0x7d   : > { %769 = vmatprep.mubr.bf16.mxu0 %v886_v12  ;;  %777 = vmatprep.mubr.bf16.mxu1 %v887_v13 }
  0x84   : > { %770 = vmatmul.mubr.bf16.gmra.mrb[4].mxu0 %v888_v14  ;;  %778 = vmatmul.mubr.bf16.gmra.mrb[4].mxu1 %v889_v15 }
 0x14f   : > { %v767_v16 = vpop.f32.mrb[0].mxu0  ;;  %v775_v17 = vpop.f32.mrb[0].mxu1 }
 0x150   : > { %v365_v18 = vpop.f32.mrb[1].mxu0  ;;  %v397_v19 = vpop.f32.mrb[1].mxu1 }
 0x151   : > { %v768_v20 = vpop.f32.mrb[2].mxu0  ;;  %v776_v21 = vpop.f32.mrb[2].mxu1 }
 0x152   : > { %v694_v22 = vpack.c.bf16 %v768_v20, %v767_v16  ;;  %v714_v23 = vpack.c.bf16 %v776_v21, %v775_v17  ;;  %v368_v24 = vpop.f32.mrb[3].mxu0  ;;  %v400_v25 = vpop.f32.mrb[3].mxu1 }
 0x153   : > { %v689_v26 = vpack.c.bf16 %v368_v24, %v365_v18  ;;  %v709_v27 = vpack.c.bf16 %v400_v25, %v397_v19 }
 0x154   : > { %726 = vst [vmem:[%s198_s17 + $0x8] sm:$0xff] %v694_v22   ;;  %730 = vst [vmem:[%s198_s17 + $0x28] sm:$0xff] %v714_v23  }
 0x155   : > { %690 = vst [vmem:[%s198_s17] sm:$0xff] %v689_v26   ;;  %729 = vst [vmem:[%s198_s17 + $0x20] sm:$0xff] %v709_v27  }
 0x157   : > { %v771_v28 = vpop.f32.mrb[4].mxu0  ;;  %v779_v29 = vpop.f32.mrb[4].mxu1 }
 0x158   : > { %v381_v30 = vpop.f32.mrb[5].mxu0  ;;  %v413_v31 = vpop.f32.mrb[5].mxu1 }
 0x159   : > { %v772_v32 = vpop.f32.mrb[6].mxu0  ;;  %v780_v33 = vpop.f32.mrb[6].mxu1 }
 0x15a   : > { %v704_v34 = vpack.c.bf16 %v772_v32, %v771_v28  ;;  %v724_v35 = vpack.c.bf16 %v780_v33, %v779_v29  ;;  %v384_v36 = vpop.f32.mrb[7].mxu0  ;;  %v416_v37 = vpop.f32.mrb[7].mxu1 }
 0x15b   : > { %v699_v38 = vpack.c.bf16 %v384_v36, %v381_v30  ;;  %v719_v39 = vpack.c.bf16 %v416_v37, %v413_v31 }
 0x15c   : > { %728 = vst [vmem:[%s198_s17 + $0x18] sm:$0xff] %v704_v34   ;;  %732 = vst [vmem:[%s198_s17 + $0x38] sm:$0xff] %v724_v35  }
 0x15d   : > { %727 = vst [vmem:[%s198_s17 + $0x10] sm:$0xff] %v699_v38   ;;  %731 = vst [vmem:[%s198_s17 + $0x30] sm:$0xff] %v719_v39  }
 0x15e   : > { %961 = shalt.err (!%p958_p5)
}
 0x15f   : > { %s962_s23 = scalar_lea.hbm %s1247_s5, 1024  ;;  %s966_s26 = scalar_lea.hbm %s1297_s2, 3072 }
 0x160   : > { %p963_p9 = scmp.ne.s32.totalorder %s1247_s5, %s962_s23  ;;  %p967_p3 = scmp.lt.u32.totalorder %s1247_s5, %s1297_s2 }
 0x161   : > { %p968_p7 = scmp.lt.u32.totalorder %s966_s26, %s962_s23  ;;  %p970_p4 = scmp.lt.u32.totalorder %s962_s23, %s1247_s5 }
 0x162   : > { %p964_p1 = pnand %p963_p9, %p1156_p11 }
 0x163   : > { %p969_p13 = por %p968_p7, %p967_p3 }
 0x164   : > { %p965_p2 = pneg %p964_p1 }
 0x165   : > { %p971_p6 = por %p970_p4, %p969_p13 }
 0x167   : > { %p972_p8 = pnand %p971_p6, %p965_p2 }
 0x169   : > { %975 = shalt.err (!%p972_p8)
}
 0x16a   : > { %s1041_s6 = smov 64   ;;  %s1042_s17 = smov 4  }
 0x16b   : > { %803 = dma.vmem_to_hbm [thread:$0]  (%p1156_p11), %s1242_s19, 1024, %s1247_s5, %s509_s12, %s1041_s6, %s1041_s6, %s1042_s17  }
 0x16c PF: > { %p820_p12 = scmp.ge.s32.totalorder %s1034_s14, 2  ;;  %s538_s21 = sand.u32 1, %s1014_s9  }
 0x16d   : > { %p1315_p10 = scmp.ne.s32.totalorder %s1305_s20, 0  ;;  %s539_s7 = scalar_lea.sflag [#allocation4], %s538_s21 }
 0x16f   : > { %p814_p0 = pnand %p820_p12, %p1315_p10 }
 0x171   : > { %1009 = dma.done.wait (!%p814_p0), %s539_s7, 1024  }
 0x172   : > { %1011 = vsyncadd (!%p814_p0), %s539_s7, 4294966272  ;;  %s19_s14 = sadd.s32 1, %s1034_s14   ;;  %s1316_s9 = smov %s1018_s10 }
 0x173   : > { %p16_p5 = scmp.ge.s32.totalorder %s19_s14, 5   ;;  %s1317_s10 = smov %s1022_s11 }
 0x174   : > { %s1318_s11 = smov %s1165_s28  ;;  %s1319_s12 = smov %s1030_s13 }
 0x175   : > { %s1320_s13 = smov %s1322_s25  ;;  %18 = sbr.rel (!%p16_p5) target bundleno = 7 (0x7), region = 79 }
 0x17c   :  { %544 = vsyncpa [#allocation3], 1 }
 0x17d   :  { %546 = vsyncpa [#allocation3 + $0x1], 1 }
 0x17e   :  { %547 = vsyncpa [#allocation6], 1 }
 0x17f   :  { %549 = vsyncpa [#allocation6 + $0x1], 1 }
 0x180   :  { %550 = vsyncpa [#allocation4], 1 }
 0x181   :  { %552 = vsyncpa [#allocation4 + $0x1], 1 }

</bundles_post_ra>
